<compile_context>
chip_gen: v7x
topology: tpu7x:2x2x1
jax: 0.10.0
libtpu: 0.0.40
codegen_flags: <defaults>
</compile_context>

<pallas_src>
import functools

import numpy as np
import jax
import jax.numpy as jnp
from jax.experimental import pallas as pl
from jax.experimental.pallas import tpu as pltpu  # noqa: F401  (TPU backend assumed)

EPS = 1e-5
LANE = 128      # lane width  (feature dims padded to multiples of this)
SUBLANE = 8     # f32 sublane (batch padded to this)

# ----------------------- model configuration (small) -----------------------
BATCH = 2
LATENT_DIM = 16
NUM_FREQ = 8
# conv_input_shape = (per-sample conv input (C, T, F), unused, encoder time lengths)
CONV_INPUT_SHAPE = ((32, 3, 1), (1, 16, 8), [16, 16, 7, 3])
FC_NODES = [64] + [int(np.prod(CONV_INPUT_SHAPE[0]))]          # [64, 96]
CHANNELS = [32, 16, 8] + [1]                                   # kwargs-reduced channels
KERNELS = [(3, 1), (3, 1), (1, NUM_FREQ)]
STRIDES = [(2, 1), (2, 1), (1, 1)]
assert CHANNELS[-1] == 1

# output paddings, exactly as computed in ConvDecoder.__init__
_LENS = CONV_INPUT_SHAPE[2]
_T_INS = _LENS[1:][::-1]
_T_OUTS = _LENS[:-1][::-1]
OUT_PADS = []
for _k, _s, _ti, _to in zip(KERNELS, STRIDES, _T_INS, _T_OUTS):
    _exp = (_ti - 1) * _s[0] + _k[0]
    _op = _to - _exp if _exp != _to else 0
    assert _op >= 0, "invalid (negative) output_padding for this configuration"
    OUT_PADS.append((_op, 0))


def _round_up(n, m):
    return ((n + m - 1) // m) * m


# ------------------------------- Pallas kernel ------------------------------
def _decoder_kernel(*refs, relu_flags):
    """Entire decoder: chained bf16 MXU matmuls with f32 bias (+ ReLU) epilogues.

    refs = (x_ref, w1_ref, b1_ref, ..., wL_ref, bL_ref, out_ref).
    Intermediate activations stay in vregs/VMEM; nothing round-trips to HBM.
    """
    x_ref, o_ref = refs[0], refs[-1]
    wb = refs[1:-1]
    h = x_ref[...]                                   # f32 (B_pad, 128)
    for i, relu in enumerate(relu_flags):
        w_ref, b_ref = wb[2 * i], wb[2 * i + 1]
        y = jnp.dot(h.astype(w_ref.dtype), w_ref[...],      # bf16 x bf16 on the MXU
                    preferred_element_type=jnp.float32)      # f32 accumulate
        y = y + b_ref[...]                                   # f32 epilogue (VPU)
        if relu:
            y = jnp.maximum(y, 0.0)
        h = y
    o_ref[...] = h.astype(o_ref.dtype)


# ------------------------------ parameter setup -----------------------------
def init_params(key):
    params = {"fc": [], "conv": []}
    fc_dims = [LATENT_DIM] + FC_NODES
    for h_in, h_out in zip(fc_dims[:-1], fc_dims[1:]):
        key, k1, k2, k3, k4, k5, k6 = jax.random.split(key, 7)
        lim = 1.0 / np.sqrt(h_in)
        W = jax.random.uniform(k1, (h_in, h_out), jnp.float32, -lim, lim)
        b = jax.random.uniform(k2, (h_out,), jnp.float32, -lim, lim)
        gamma = jax.random.uniform(k3, (h_out,), jnp.float32, 0.5, 1.5)
        beta = jax.random.uniform(k4, (h_out,), jnp.float32, -0.1, 0.1)
        rmean = jax.random.uniform(k5, (h_out,), jnp.float32, -0.1, 0.1)
        rvar = jax.random.uniform(k6, (h_out,), jnp.float32, 0.5, 1.5)
        params["fc"].append((W, b, gamma, beta, rmean, rvar))
    for c_in, c_out, k in zip(CHANNELS, CHANNELS[1:], KERNELS):
        key, k1, k2, k3, k4, k5, k6 = jax.random.split(key, 7)
        fan_in = c_in * k[0] * k[1]
        lim = 1.0 / np.sqrt(fan_in)
        W = jax.random.uniform(k1, (c_in, c_out, k[0], k[1]), jnp.float32, -lim, lim)
        b = jax.random.uniform(k2, (c_out,), jnp.float32, -lim, lim)
        if c_out != 1:
            bn = (
                jax.random.uniform(k3, (c_out,), jnp.float32, 0.5, 1.5),   # gamma
                jax.random.uniform(k4, (c_out,), jnp.float32, -0.1, 0.1),  # beta
                jax.random.uniform(k5, (c_out,), jnp.float32, -0.1, 0.1),  # running_mean
                jax.random.uniform(k6, (c_out,), jnp.float32, 0.5, 1.5),   # running_var
            )
        else:
            bn = None
        params["conv"].append((W, b, bn))
    return params


def deconv_matrix(W, t_in, f_in, stride, out_pad):
    """Lower a ConvTranspose2d weight (C_in, C_out, kH, kW) to a dense matmul
    matrix over (C, T, F) row-major flattened features (host glue, runs once)."""
    c_in, c_out, kh, kw = W.shape
    sh, sw = stride
    t_out = (t_in - 1) * sh + kh + out_pad[0]
    f_out = (f_in - 1) * sw + kw + out_pad[1]
    M = np.zeros((c_in * t_in * f_in, c_out * t_out * f_out), dtype=np.float32)
    Wn = np.asarray(W, dtype=np.float32)
    ci = np.arange(c_in)
    co = np.arange(c_out)
    for t in range(t_in):
        for f in range(f_in):
            for p in range(kh):
                for q in range(kw):
                    ot, of = t * sh + p, f * sw + q
                    rows = (ci * t_in + t) * f_in + f
                    cols = (co * t_out + ot) * f_out + of
                    M[np.ix_(rows, cols)] += Wn[:, :, p, q]
    return M, t_out, f_out


def prepare_packed_params(params):
    """Fold everything into 5 dense (W, bias, relu) layers, lane/sublane-pad, cast to
    bf16.  Runs ONCE at init on the host; the forward is then a single jitted call."""
    dense = []  # (W_folded (K, N) f32, bias (N,) f32, relu)

    # FC stack: Linear + BatchNorm1d(eval) + ReLU
    for layer in params["fc"]:
        W, b, g, be, m, v = (np.asarray(a, np.float32) for a in layer)
        s = g / np.sqrt(v + EPS)
        dense.append((W * s[None, :], (b - m) * s + be, True))

    # Conv stack: ConvTranspose2d (+ BatchNorm2d(eval) + ReLU) as dense scatter matmuls
    t_in, f_in = CONV_INPUT_SHAPE[0][1], CONV_INPUT_SHAPE[0][2]
    for li, (W, b, bn) in enumerate(params["conv"]):
        Wn = np.asarray(W, np.float32)
        b = np.asarray(b, np.float32)
        M, t_out, f_out = deconv_matrix(Wn, t_in, f_in, STRIDES[li], OUT_PADS[li])
        c_out = Wn.shape[1]
        if bn is not None:
            g, be, m, v = (np.asarray(a, np.float32) for a in bn)
            s_c = g / np.sqrt(v + EPS)
            bias_c = (b - m) * s_c + be
            relu = True
        else:
            s_c = np.ones((c_out,), np.float32)
            bias_c = b
            relu = False
        col_scale = np.repeat(s_c, t_out * f_out).astype(np.float32)
        col_bias = np.repeat(bias_c, t_out * f_out).astype(np.float32)
        dense.append((M * col_scale[None, :], col_bias, relu))
        t_in, f_in = t_out, f_out

    # Pad every feature dim to a multiple of 128 (lane-dense / unmasked stores), chain
    # the K padding to the previous layer's padded N, cast MXU operands to bf16.
    ws, bs, relu_flags = [], [], []
    k_pad = _round_up(LATENT_DIM, LANE)
    for (Wf, bf, relu) in dense:
        K, N = Wf.shape
        n_pad = _round_up(N, LANE)
        Wp = np.zeros((k_pad, n_pad), np.float32)
        Wp[:K, :N] = Wf
        bp = np.zeros((1, n_pad), np.float32)
        bp[0, :N] = bf
        ws.append(jnp.asarray(Wp, dtype=jnp.bfloat16))   # MXU operand (half the DMA)
        bs.append(jnp.asarray(bp, dtype=jnp.float32))    # f32 epilogue
        relu_flags.append(relu)
        k_pad = n_pad

    meta = dict(
        in_pad=_round_up(LATENT_DIM, LANE),
        out_features=dense[-1][0].shape[1],   # real (unpadded) output width
        t_final=t_in,
        f_final=f_in,
    )
    return tuple(ws), tuple(bs), tuple(relu_flags), meta


# ------------------------------ decoder forward -----------------------------
def build_decoder_forward(ws, bs, relu_flags, meta):
    kernel = functools.partial(_decoder_kernel, relu_flags=tuple(relu_flags))
    b_pad = SUBLANE
    in_pad = meta["in_pad"]
    out_pad = ws[-1].shape[1]
    out_features = meta["out_features"]
    t_final, f_final = meta["t_final"], meta["f_final"]

    @jax.jit
    def forward(z, ws, bs):
        B, K = z.shape
        # Sublane-pad batch (2 -> 8) and lane-pad the latent (16 -> 128).  Padding is
        # inert: padded weight rows/columns and biases are all zero.
        x = jnp.pad(z.astype(jnp.float32), ((0, b_pad - B), (0, in_pad - K)))
        flat = []
        for w, b in zip(ws, bs):
            flat.extend((w, b))
        out = pl.pallas_call(
            kernel,
            out_shape=jax.ShapeDtypeStruct((b_pad, out_pad), jnp.float32),
            # No grid / BlockSpecs: every (tiny, tile-aligned) operand lives whole in
            # VMEM; nothing to pipeline at ~0.2 MiB total, so no double-buffering.
        )(x, *flat)
        out = out[:B, :out_features]
        # Columns are the row-major (C_out=1, T, F) flattening -> reshape == squeeze(1).
        return out.reshape(B, t_final, f_final)

    return forward


# --------------------------- pure-numpy reference ---------------------------
def reference_forward(z, params):
    x = np.asarray(z, dtype=np.float32)
    for layer in params["fc"]:
        W, b, g, be, m, v = (np.asarray(a, dtype=np.float32) for a in layer)
        y = x @ W + b
        y = (y - m) / np.sqrt(v + EPS) * g + be
        x = np.maximum(y, 0.0)
    B = x.shape[0]
    C0, T0, F0 = CONV_INPUT_SHAPE[0]
    x = x.reshape(B, C0, T0, F0)
    for li, (W, b, bn) in enumerate(params["conv"]):
        W = np.asarray(W, np.float32)
        b = np.asarray(b, np.float32)
        c_in, c_out, kh, kw = W.shape
        sh, sw = STRIDES[li]
        oph, opw = OUT_PADS[li]
        T, F = x.shape[2], x.shape[3]
        To = (T - 1) * sh + kh + oph
        Fo = (F - 1) * sw + kw + opw
        out = np.zeros((B, c_out, To, Fo), np.float32)
        for t in range(T):
            for f in range(F):
                for p in range(kh):
                    for q in range(kw):
                        out[:, :, t * sh + p, f * sw + q] += x[:, :, t, f] @ W[:, :, p, q]
        out = out + b[None, :, None, None]
        if bn is not None:
            g, be, m, v = (np.asarray(a, np.float32) for a in bn)
            out = (out - m[None, :, None, None]) / np.sqrt(v + EPS)[None, :, None, None]
            out = out * g[None, :, None, None] + be[None, :, None, None]
            out = np.maximum(out, 0.0)
        x = out
    return x[:, 0]


# ------------------------------------ main -----------------------------------
if __name__ == "__main__":
    key = jax.random.PRNGKey(0)
    kp, kz = jax.random.split(key)
    params = init_params(kp)
    z = jax.random.normal(kz, (BATCH, LATENT_DIM), jnp.float32)

    ws, bs, relu_flags, meta = prepare_packed_params(params)   # host-side, once
    decoder_forward = build_decoder_forward(ws, bs, relu_flags, meta)

    out = decoder_forward(z, ws, bs)
    out = jax.block_until_ready(out)

    assert out.shape == (BATCH, CONV_INPUT_SHAPE[2][0], NUM_FREQ), out.shape
    ref = reference_forward(z, params)
    # Tolerance accounts for bf16 MXU operands (f32 accumulate/epilogue) vs f32 reference.
    np.testing.assert_allclose(np.asarray(out), ref, rtol=5e-2, atol=5e-2)
    print("KERNEL_OK")
</pallas_src>

<mosaic_0001>
module attributes {stable_mosaic.version = 11 : i64} {
  func.func @_decoder_kernel(%arg0: memref<8x128xf32, #tpu.memory_space<vmem>>, %arg1: memref<128x128xbf16, #tpu.memory_space<vmem>>, %arg2: memref<1x128xf32, #tpu.memory_space<vmem>>, %arg3: memref<128x128xbf16, #tpu.memory_space<vmem>>, %arg4: memref<1x128xf32, #tpu.memory_space<vmem>>, %arg5: memref<128x128xbf16, #tpu.memory_space<vmem>>, %arg6: memref<1x128xf32, #tpu.memory_space<vmem>>, %arg7: memref<128x128xbf16, #tpu.memory_space<vmem>>, %arg8: memref<1x128xf32, #tpu.memory_space<vmem>>, %arg9: memref<128x128xbf16, #tpu.memory_space<vmem>>, %arg10: memref<1x128xf32, #tpu.memory_space<vmem>>, %arg11: memref<8x128xf32, #tpu.memory_space<vmem>>) attributes {dimension_semantics = [], scalar_prefetch = 0 : i64, scratch_operands = 0 : i64, tpu.core_type = #tpu.core_type<tc>} {
    %c0 = arith.constant 0 : index
    %c0_0 = arith.constant 0 : index
    %0 = vector.load %arg0[%c0, %c0_0] : memref<8x128xf32, #tpu.memory_space<vmem>>, vector<8x128xf32>
    %1 = arith.truncf %0 : vector<8x128xf32> to vector<8x128xbf16>
    %c0_1 = arith.constant 0 : index
    %c0_2 = arith.constant 0 : index
    %2 = vector.load %arg1[%c0_1, %c0_2] : memref<128x128xbf16, #tpu.memory_space<vmem>>, vector<128x128xbf16>
    %cst = arith.constant dense<0.000000e+00> : vector<8x128xf32>
    %3 = tpu.matmul %1, %2, %cst {dimension_numbers = #tpu.dot_dimension_numbers<[1], [0], [0], [1], [0, 0, 1, 1], [], []>} : vector<8x128xbf16>, vector<128x128xbf16>, vector<8x128xf32> -> vector<8x128xf32>
    %c0_3 = arith.constant 0 : index
    %c0_4 = arith.constant 0 : index
    %4 = vector.load %arg2[%c0_3, %c0_4] : memref<1x128xf32, #tpu.memory_space<vmem>>, vector<1x128xf32>
    %5 = vector.broadcast %4 : vector<1x128xf32> to vector<8x128xf32>
    %6 = arith.addf %3, %5 : vector<8x128xf32>
    %cst_5 = arith.constant 0.000000e+00 : f32
    %7 = vector.broadcast %cst_5 : f32 to vector<8x128xf32>
    %8 = arith.maximumf %6, %7 : vector<8x128xf32>
    %9 = arith.truncf %8 : vector<8x128xf32> to vector<8x128xbf16>
    %c0_6 = arith.constant 0 : index
    %c0_7 = arith.constant 0 : index
    %10 = vector.load %arg3[%c0_6, %c0_7] : memref<128x128xbf16, #tpu.memory_space<vmem>>, vector<128x128xbf16>
    %cst_8 = arith.constant dense<0.000000e+00> : vector<8x128xf32>
    %11 = tpu.matmul %9, %10, %cst_8 {dimension_numbers = #tpu.dot_dimension_numbers<[1], [0], [0], [1], [0, 0, 1, 1], [], []>} : vector<8x128xbf16>, vector<128x128xbf16>, vector<8x128xf32> -> vector<8x128xf32>
    %c0_9 = arith.constant 0 : index
    %c0_10 = arith.constant 0 : index
    %12 = vector.load %arg4[%c0_9, %c0_10] : memref<1x128xf32, #tpu.memory_space<vmem>>, vector<1x128xf32>
    %13 = vector.broadcast %12 : vector<1x128xf32> to vector<8x128xf32>
    %14 = arith.addf %11, %13 : vector<8x128xf32>
    %cst_11 = arith.constant 0.000000e+00 : f32
    %15 = vector.broadcast %cst_11 : f32 to vector<8x128xf32>
    %16 = arith.maximumf %14, %15 : vector<8x128xf32>
    %17 = arith.truncf %16 : vector<8x128xf32> to vector<8x128xbf16>
    %c0_12 = arith.constant 0 : index
    %c0_13 = arith.constant 0 : index
    %18 = vector.load %arg5[%c0_12, %c0_13] : memref<128x128xbf16, #tpu.memory_space<vmem>>, vector<128x128xbf16>
    %cst_14 = arith.constant dense<0.000000e+00> : vector<8x128xf32>
    %19 = tpu.matmul %17, %18, %cst_14 {dimension_numbers = #tpu.dot_dimension_numbers<[1], [0], [0], [1], [0, 0, 1, 1], [], []>} : vector<8x128xbf16>, vector<128x128xbf16>, vector<8x128xf32> -> vector<8x128xf32>
    %c0_15 = arith.constant 0 : index
    %c0_16 = arith.constant 0 : index
    %20 = vector.load %arg6[%c0_15, %c0_16] : memref<1x128xf32, #tpu.memory_space<vmem>>, vector<1x128xf32>
    %21 = vector.broadcast %20 : vector<1x128xf32> to vector<8x128xf32>
    %22 = arith.addf %19, %21 : vector<8x128xf32>
    %cst_17 = arith.constant 0.000000e+00 : f32
    %23 = vector.broadcast %cst_17 : f32 to vector<8x128xf32>
    %24 = arith.maximumf %22, %23 : vector<8x128xf32>
    %25 = arith.truncf %24 : vector<8x128xf32> to vector<8x128xbf16>
    %c0_18 = arith.constant 0 : index
    %c0_19 = arith.constant 0 : index
    %26 = vector.load %arg7[%c0_18, %c0_19] : memref<128x128xbf16, #tpu.memory_space<vmem>>, vector<128x128xbf16>
    %cst_20 = arith.constant dense<0.000000e+00> : vector<8x128xf32>
    %27 = tpu.matmul %25, %26, %cst_20 {dimension_numbers = #tpu.dot_dimension_numbers<[1], [0], [0], [1], [0, 0, 1, 1], [], []>} : vector<8x128xbf16>, vector<128x128xbf16>, vector<8x128xf32> -> vector<8x128xf32>
    %c0_21 = arith.constant 0 : index
    %c0_22 = arith.constant 0 : index
    %28 = vector.load %arg8[%c0_21, %c0_22] : memref<1x128xf32, #tpu.memory_space<vmem>>, vector<1x128xf32>
    %29 = vector.broadcast %28 : vector<1x128xf32> to vector<8x128xf32>
    %30 = arith.addf %27, %29 : vector<8x128xf32>
    %cst_23 = arith.constant 0.000000e+00 : f32
    %31 = vector.broadcast %cst_23 : f32 to vector<8x128xf32>
    %32 = arith.maximumf %30, %31 : vector<8x128xf32>
    %33 = arith.truncf %32 : vector<8x128xf32> to vector<8x128xbf16>
    %c0_24 = arith.constant 0 : index
    %c0_25 = arith.constant 0 : index
    %34 = vector.load %arg9[%c0_24, %c0_25] : memref<128x128xbf16, #tpu.memory_space<vmem>>, vector<128x128xbf16>
    %cst_26 = arith.constant dense<0.000000e+00> : vector<8x128xf32>
    %35 = tpu.matmul %33, %34, %cst_26 {dimension_numbers = #tpu.dot_dimension_numbers<[1], [0], [0], [1], [0, 0, 1, 1], [], []>} : vector<8x128xbf16>, vector<128x128xbf16>, vector<8x128xf32> -> vector<8x128xf32>
    %c0_27 = arith.constant 0 : index
    %c0_28 = arith.constant 0 : index
    %36 = vector.load %arg10[%c0_27, %c0_28] : memref<1x128xf32, #tpu.memory_space<vmem>>, vector<1x128xf32>
    %37 = vector.broadcast %36 : vector<1x128xf32> to vector<8x128xf32>
    %38 = arith.addf %35, %37 : vector<8x128xf32>
    %c0_29 = arith.constant 0 : index
    %c0_30 = arith.constant 0 : index
    %39 = vector.load %arg11[%c0_29, %c0_30] : memref<8x128xf32, #tpu.memory_space<vmem>>, vector<8x128xf32>
    tpu.vector_store %arg11[%c0_29, %c0_30], %38 {strides = array<i32>} : memref<8x128xf32, #tpu.memory_space<vmem>>, vector<8x128xf32>,
    return
  }
}

</mosaic_0001>

<bundles_post_ra>
// kernel: forward.1
= control target key start
LH: loop header
LB: loop body
LE: loop exit
PB: predicated region body
PF: predicated region fallthrough
CT: control target
= control target key end

     0   :  { %16 = vsyncpa [#allocation3], 0  ;;  %s1264_s0 = inlined_call_operand.vmem [shape: f32[8,128], index: 0, kind: input, shape index: {}]   ;;  %s1265_s1 = inlined_call_operand.hbm [shape: bf16[128,128], index: 1, kind: input, shape index: {}]   ;;  %s1266_s2 = inlined_call_operand.vmem [shape: f32[1,128], index: 2, kind: input, shape index: {}]   ;;  %s1267_s3 = inlined_call_operand.hbm [shape: bf16[128,128], index: 3, kind: input, shape index: {}]   ;;  %s1268_s4 = inlined_call_operand.vmem [shape: f32[1,128], index: 4, kind: input, shape index: {}]   ;;  %s1269_s5 = inlined_call_operand.hbm [shape: bf16[128,128], index: 5, kind: input, shape index: {}]   ;;  %s1270_s6 = inlined_call_operand.vmem [shape: f32[1,128], index: 6, kind: input, shape index: {}]   ;;  %s1271_s7 = inlined_call_operand.hbm [shape: bf16[128,128], index: 7, kind: input, shape index: {}]   ;;  %s1272_s8 = inlined_call_operand.vmem [shape: f32[1,128], index: 8, kind: input, shape index: {}]   ;;  %s1273_s9 = inlined_call_operand.hbm [shape: bf16[128,128], index: 9, kind: input, shape index: {}]   ;;  %s1274_s10 = inlined_call_operand.vmem [shape: f32[1,128], index: 10, kind: input, shape index: {}]   ;;  %s1275_s11 = inlined_call_operand.vmem [shape: f32[8,128], index: 11, kind: output, shape index: {}]  }
   0x1   :  { %17 = vsyncpa [#allocation5], 0 }
   0x2   :  { %18 = vsyncpa [#allocation8], 0  ;;  %s1035_s17 = smov [#allocation4]   ;;  %s1036_s19 = smov [#allocation7]  }
   0x3   :  { %s40_s18 = sshll.u32 %s1035_s17, 4  ;;  %s68_s20 = sshll.u32 %s1036_s19, 4  ;;  %s41_s18 = int_to_ptr.vmem [resolvable:$true] %s40_s18  ;;  %s1104_s20 = int_to_ptr.vmem [resolvable:$true] %s68_s20 }
   0x4   :  { %s919_s23 = scalar_lea.hbm %s1267_s3, 1024 }
   0x5   :  { %p920_p0 = scmp.ne.s32.totalorder %s1267_s3, %s919_s23  ;;  %p923_p1 = scmp.lt.u32.totalorder %s919_s23, %s1267_s3 }
   0x7   :  { %p925_p2 = pnand %p923_p1, %p920_p0 }
   0x9   :  { %928 = shalt.err (!%p925_p2)
}
   0xa   :  { %s929_s28 = scalar_lea.vmem %s41_s18, 1024  ;;  %p934_p4 = scmp.lt.s32.totalorder %s41_s18, %s41_s18 }
   0xb   :  { %p930_p3 = scmp.ne.s32.totalorder %s41_s18, %s929_s28  ;;  %p935_p5 = scmp.lt.s32.totalorder %s929_s28, %s929_s28 }
   0xd   :  { %p936_p6 = por %p935_p5, %p934_p4 }
   0xf   :  { %p937_p7 = pnand %p936_p6, %p930_p3 }
  0x11   :  { %940 = shalt.err (!%p937_p7)
}
  0x12   :  { %s1037_s29 = smov 64   ;;  %s1038_s30 = smov 4  }
  0x13   :  { %46 = dma.hbm_to_vmem [thread:$0]  %s1267_s3, 1024, %s41_s18, [#allocation5], %s1037_s29, %s1037_s29, %s1038_s30  }
  0x14   :  { %s941_s16 = scalar_lea.hbm %s1271_s7, 1024 }
  0x15   :  { %p942_p8 = scmp.ne.s32.totalorder %s1271_s7, %s941_s16  ;;  %p945_p9 = scmp.lt.u32.totalorder %s941_s16, %s1271_s7 }
  0x17   :  { %p947_p10 = pnand %p945_p9, %p942_p8 }
  0x19   :  { %950 = shalt.err (!%p947_p10)
}
  0x1a   :  { %s951_s23 = scalar_lea.vmem %s1104_s20, 1024  ;;  %p956_p12 = scmp.lt.s32.totalorder %s1104_s20, %s1104_s20 }
  0x1b   :  { %p952_p11 = scmp.ne.s32.totalorder %s1104_s20, %s951_s23  ;;  %p957_p13 = scmp.lt.s32.totalorder %s951_s23, %s951_s23 }
  0x1d   :  { %p958_p0 = por %p957_p13, %p956_p12 }
  0x1f   :  { %p959_p1 = pnand %p958_p0, %p952_p11 }
  0x21   :  { %962 = shalt.err (!%p959_p1)
}
  0x22   :  { %74 = dma.hbm_to_vmem [thread:$0]  %s1271_s7, 1024, %s1104_s20, [#allocation8], %s1037_s29, %s1037_s29, %s1038_s30  }
  0x23   :  { %s1039_s24 = smov [#allocation2]   ;;  %s1040_s26 = smov [#allocation6]  }
  0x24   :  { %s26_s25 = sshll.u32 %s1039_s24, 4  ;;  %s54_s27 = sshll.u32 %s1040_s26, 4  ;;  %s27_s25 = int_to_ptr.vmem [resolvable:$true] %s26_s25  ;;  %s1141_s27 = int_to_ptr.vmem [resolvable:$true] %s54_s27 }
  0x25   :  { %s963_s13 = scalar_lea.hbm %s1265_s1, 1024 }
  0x26   :  { %p964_p2 = scmp.ne.s32.totalorder %s1265_s1, %s963_s13  ;;  %p967_p3 = scmp.lt.u32.totalorder %s963_s13, %s1265_s1 }
  0x28   :  { %p969_p4 = pnand %p967_p3, %p964_p2 }
  0x2a   :  { %972 = shalt.err (!%p969_p4)
}
  0x2b   :  { %s973_s7 = scalar_lea.vmem %s27_s25, 1024  ;;  %p978_p6 = scmp.lt.s32.totalorder %s27_s25, %s27_s25 }
  0x2c   :  { %p974_p5 = scmp.ne.s32.totalorder %s27_s25, %s973_s7  ;;  %p979_p7 = scmp.lt.s32.totalorder %s973_s7, %s973_s7 }
  0x2e   :  { %p980_p8 = por %p979_p7, %p978_p6 }
  0x30   :  { %p981_p9 = pnand %p980_p8, %p974_p5 }
  0x32   :  { %984 = shalt.err (!%p981_p9)
}
  0x33   :  { %32 = dma.hbm_to_vmem [thread:$0]  %s1265_s1, 1024, %s27_s25, [#allocation3], %s1037_s29, %s1037_s29, %s1038_s30  }
  0x34   :  { %s985_s23 = scalar_lea.hbm %s1269_s5, 1024 }
  0x35   :  { %p986_p10 = scmp.ne.s32.totalorder %s1269_s5, %s985_s23  ;;  %p989_p11 = scmp.lt.u32.totalorder %s985_s23, %s1269_s5 }
  0x37   :  { %p991_p12 = pnand %p989_p11, %p986_p10 }
  0x39   :  { %994 = shalt.err (!%p991_p12)
}
  0x3a   :  { %s995_s28 = scalar_lea.vmem %s1141_s27, 1024  ;;  %p1000_p0 = scmp.lt.s32.totalorder %s1141_s27, %s1141_s27 }
  0x3b   :  { %p996_p13 = scmp.ne.s32.totalorder %s1141_s27, %s995_s28  ;;  %p1001_p1 = scmp.lt.s32.totalorder %s995_s28, %s995_s28 }
  0x3d   :  { %p1002_p2 = por %p1001_p1, %p1000_p0 }
  0x3f   :  { %p1003_p3 = pnand %p1002_p2, %p996_p13 }
  0x41   :  { %1006 = shalt.err (!%p1003_p3)
}
  0x42   :  { %60 = dma.hbm_to_vmem [thread:$0]  %s1269_s5, 1024, %s1141_s27, [#allocation5], %s1037_s29, %s1037_s29, %s1038_s30  }
  0x43   :  { %s1041_s12 = smov [#allocation9]   ;;  %s1007_s16 = scalar_lea.hbm %s1273_s9, 1024 }
  0x44   :  { %s82_s13 = sshll.u32 %s1041_s12, 4  ;;  %p1008_p4 = scmp.ne.s32.totalorder %s1273_s9, %s1007_s16  ;;  %s83_s13 = int_to_ptr.vmem [resolvable:$true] %s82_s13 }
  0x45   :  { %p1011_p5 = scmp.lt.u32.totalorder %s1007_s16, %s1273_s9 }
  0x47   :  { %p1013_p6 = pnand %p1011_p5, %p1008_p4 }
  0x49   :  { %1016 = shalt.err (!%p1013_p6)
}
  0x4a   :  { %s1017_s21 = scalar_lea.vmem %s83_s13, 1024  ;;  %p1022_p8 = scmp.lt.s32.totalorder %s83_s13, %s83_s13 }
  0x4b   :  { %p1018_p7 = scmp.ne.s32.totalorder %s83_s13, %s1017_s21  ;;  %p1023_p9 = scmp.lt.s32.totalorder %s1017_s21, %s1017_s21 }
  0x4d   :  { %p1024_p10 = por %p1023_p9, %p1022_p8 }
  0x4f   :  { %p1025_p11 = pnand %p1024_p10, %p1018_p7 }
  0x51   :  { %1028 = shalt.err (!%p1025_p11)
}
  0x52   :  { %88 = dma.hbm_to_vmem [thread:$0]  %s1273_s9, 1024, %s83_s13, [#allocation8], %s1037_s29, %s1037_s29, %s1038_s30  }
  0x53   :  { %1029 = dma.done.wait [#allocation3], 1024  }
  0x54   :  { %1030 = vsyncadd [#allocation3], 4294966272 }
  0x55   :  { %1031 = dma.done.wait [#allocation5], 2048  }
  0x56   :  { %1032 = vsyncadd [#allocation5], 4294965248 }
  0x57   :  { %1033 = dma.done.wait [#allocation8], 2048  }
  0x58   :  { %1034 = vsyncadd [#allocation8], 4294965248  ;;  %v1042_v0 = vmov 0.0   ;;  %vm1043_vm0 = vmmov 0   ;;  %v879_v1 = vld [vmem:[#allocation2] sm:$0xff]   ;;  %v880_v2 = vld [vmem:[#allocation2 + $0x8] sm:$0xff]  }
  0x59   :  { %770 = vmatprep.subr.bf16.mxu0 %v1042_v0  ;;  %786 = vmatprep.mubr.msk.bf16.mxu0 %vm1043_vm0, %v1042_v0  ;;  %v881_v3 = vld [vmem:[#allocation2 + $0x10] sm:$0xff]   ;;  %v887_v4 = vld [vmem:[#allocation4] sm:$0xff]   ;;  %v882_v5 = vld [vmem:[#allocation2 + $0x18] sm:$0xff]  }
  0x5a   :  { %790 = vmatprep.subr.bf16.mxu1 %v1042_v0  ;;  %806 = vmatprep.mubr.msk.bf16.mxu1 %vm1043_vm0, %v1042_v0  ;;  %v888_v6 = vld [vmem:[#allocation4 + $0x8] sm:$0xff]   ;;  %v883_v7 = vld [vmem:[#allocation2 + $0x20] sm:$0xff]   ;;  %v889_v8 = vld [vmem:[#allocation4 + $0x10] sm:$0xff]  }
  0x5b   :  { %771 = vmatpush3.bf16.msra.mxu0 %v879_v1  ;;  %791 = vmatpush3.bf16.msra.mxu1 %v887_v4  ;;  %v884_v9 = vld [vmem:[#allocation2 + $0x28] sm:$0xff]   ;;  %v890_v10 = vld [vmem:[#allocation4 + $0x18] sm:$0xff]   ;;  %v885_v11 = vld [vmem:[#allocation2 + $0x30] sm:$0xff]  }
  0x5c   :  { %772 = vmatprep.subr.bf16.mxu0 %v1042_v0  ;;  %792 = vmatprep.subr.bf16.mxu1 %v1042_v0  ;;  %v891_v12 = vld [vmem:[#allocation4 + $0x20] sm:$0xff]   ;;  %v886_v13 = vld [vmem:[#allocation2 + $0x38] sm:$0xff]   ;;  %v892_v15 = vld [vmem:[#allocation4 + $0x28] sm:$0xff]  }
  0x5d   :  { %v107_v14 = vld [vmem:[%s1264_s0] sm:$0xff]  ;;  %v893_v17 = vld [vmem:[#allocation4 + $0x30] sm:$0xff]   ;;  %v894_v18 = vld [vmem:[#allocation4 + $0x38] sm:$0xff]  }
  0x5e   :  { %v108_v16 = vpack.c.bf16 %v107_v14, %v107_v14  ;;  %v895_v19 = vld [vmem:[#allocation6] sm:$0xff]   ;;  %v896_v20 = vld [vmem:[#allocation6 + $0x8] sm:$0xff]   ;;  %v897_v21 = vld [vmem:[#allocation6 + $0x10] sm:$0xff]  }
  0x5f   :  { %773 = vmatpush3.bf16.msra.mxu0 %v880_v2  ;;  %793 = vmatpush3.bf16.msra.mxu1 %v888_v6  ;;  %v898_v22 = vld [vmem:[#allocation6 + $0x18] sm:$0xff]   ;;  %v899_v23 = vld [vmem:[#allocation6 + $0x20] sm:$0xff]   ;;  %v900_v24 = vld [vmem:[#allocation6 + $0x28] sm:$0xff]  }
  0x60   :  { %774 = vmatprep.subr.bf16.mxu0 %v1042_v0  ;;  %794 = vmatprep.subr.bf16.mxu1 %v1042_v0  ;;  %v680_v25 = vld [vmem:[%s1266_s2] ss:$0 sm:$0xff]  ;;  %v901_v33 = vld [vmem:[#allocation6 + $0x30] sm:$0xff]   ;;  %v902_v34 = vld [vmem:[#allocation6 + $0x38] sm:$0xff]  }
  0x61   :  { %v903_v35 = vld [vmem:[#allocation7] sm:$0xff]   ;;  %v904_v36 = vld [vmem:[#allocation7 + $0x8] sm:$0xff]   ;;  %v905_v37 = vld [vmem:[#allocation7 + $0x10] sm:$0xff]  }
  0x62   :  { %v906_v38 = vld [vmem:[#allocation7 + $0x18] sm:$0xff]   ;;  %v907_v39 = vld [vmem:[#allocation7 + $0x20] sm:$0xff]   ;;  %v908_v40 = vld [vmem:[#allocation7 + $0x28] sm:$0xff]  }
  0x63   :  { %775 = vmatpush3.bf16.msra.mxu0 %v881_v3  ;;  %795 = vmatpush3.bf16.msra.mxu1 %v889_v8  ;;  %v689_v41 = vld [vmem:[%s1268_s4] ss:$0 sm:$0xff]  ;;  %v909_v49 = vld [vmem:[#allocation7 + $0x30] sm:$0xff]   ;;  %v910_v50 = vld [vmem:[#allocation7 + $0x38] sm:$0xff]  }
  0x64   :  { %776 = vmatprep.subr.bf16.mxu0 %v1042_v0  ;;  %796 = vmatprep.subr.bf16.mxu1 %v1042_v0  ;;  %v911_v51 = vld [vmem:[#allocation9] sm:$0xff]   ;;  %v912_v52 = vld [vmem:[#allocation9 + $0x8] sm:$0xff]   ;;  %v913_v53 = vld [vmem:[#allocation9 + $0x10] sm:$0xff]  }
  0x65   :  { %v914_v54 = vld [vmem:[#allocation9 + $0x18] sm:$0xff]   ;;  %v915_v55 = vld [vmem:[#allocation9 + $0x20] sm:$0xff]   ;;  %v916_v56 = vld [vmem:[#allocation9 + $0x28] sm:$0xff]  }
  0x66   :  { %v698_v57 = vld [vmem:[%s1270_s6] ss:$0 sm:$0xff]  ;;  %v917_v2 = vld [vmem:[#allocation9 + $0x30] sm:$0xff]   ;;  %v918_v3 = vld [vmem:[#allocation9 + $0x38] sm:$0xff]  }
  0x67   :  { %777 = vmatpush3.bf16.msra.mxu0 %v882_v5  ;;  %797 = vmatpush3.bf16.msra.mxu1 %v890_v10  ;;  %v707_v4 = vld [vmem:[%s1272_s8] ss:$0 sm:$0xff] }
  0x68   :  { %778 = vmatprep.subr.bf16.mxu0 %v1042_v0  ;;  %798 = vmatprep.subr.bf16.mxu1 %v1042_v0 }
  0x6b   :  { %779 = vmatpush3.bf16.msra.mxu0 %v883_v7  ;;  %799 = vmatpush3.bf16.msra.mxu1 %v891_v12  ;;  %v716_v12 = vld [vmem:[%s1274_s10] ss:$0 sm:$0xff] }
  0x6c   :  { %780 = vmatprep.subr.bf16.mxu0 %v1042_v0  ;;  %800 = vmatprep.subr.bf16.mxu1 %v1042_v0 }
  0x6f   :  { %781 = vmatpush3.bf16.msra.mxu0 %v884_v9  ;;  %801 = vmatpush3.bf16.msra.mxu1 %v892_v15 }
  0x70   :  { %782 = vmatprep.subr.bf16.mxu0 %v1042_v0  ;;  %802 = vmatprep.subr.bf16.mxu1 %v1042_v0 }
  0x73   :  { %783 = vmatpush3.bf16.msra.mxu0 %v885_v11  ;;  %803 = vmatpush3.bf16.msra.mxu1 %v893_v17 }
  0x74   :  { %784 = vmatprep.subr.bf16.mxu0 %v1042_v0  ;;  %804 = vmatprep.subr.bf16.mxu1 %v1042_v0 }
  0x77   :  { %785 = vmatpush3.bf16.msra.mxu0 %v886_v13  ;;  %805 = vmatpush3.bf16.msra.mxu1 %v894_v18 }
  0x78   :  { %810 = vmatprep.subr.bf16.mxu0 %v1042_v0  ;;  %830 = vmatprep.subr.bf16.mxu1 %v1042_v0 }
  0x7a   :  { %787 = vmatmul.mubr.bf16.vlgmr.msra.gmra.mrb[0].mxu0 %v108_v16 }
  0x7b   :  { %826 = vmatprep.mubr.msk.bf16.mxu0 %vm1043_vm0, %v1042_v0  ;;  %811 = vmatpush3.bf16.msra.mxu0 %v895_v19 }
  0x7c   :  { %812 = vmatprep.subr.bf16.mxu0 %v1042_v0 }
  0x7f   :  { %813 = vmatpush3.bf16.msra.mxu0 %v896_v20 }
  0x80   :  { %814 = vmatprep.subr.bf16.mxu0 %v1042_v0 }
  0x83   :  { %815 = vmatpush3.bf16.msra.mxu0 %v897_v21 }
  0x84   :  { %816 = vmatprep.subr.bf16.mxu0 %v1042_v0 }
  0x87   :  { %817 = vmatpush3.bf16.msra.mxu0 %v898_v22 }
  0x88   :  { %818 = vmatprep.subr.bf16.mxu0 %v1042_v0 }
  0x8b   :  { %819 = vmatpush3.bf16.msra.mxu0 %v899_v23 }
  0x8c   :  { %820 = vmatprep.subr.bf16.mxu0 %v1042_v0 }
  0x8f   :  { %821 = vmatpush3.bf16.msra.mxu0 %v900_v24 }
  0x90   :  { %822 = vmatprep.subr.bf16.mxu0 %v1042_v0 }
  0x93   :  { %823 = vmatpush3.bf16.msra.mxu0 %v901_v33 }
  0x94   :  { %824 = vmatprep.subr.bf16.mxu0 %v1042_v0 }
  0x97   :  { %825 = vmatpush3.bf16.msra.mxu0 %v902_v34 }
  0x98   :  { %850 = vmatprep.subr.bf16.mxu0 %v1042_v0 }
 0x14d   :  { %v214_v26 = vpop.f32.mrb[0].mxu0 }
 0x14e   :  { %v215_v27 = vadd.f32 %v680_v25, %v214_v26  ;;  %v788_v28 = vpop.f32.mrb[1].mxu0 }
 0x14f   :  { %v217_v29 = vpop.f32.mrb[2].mxu0 }
 0x150   :  { %v220_v30 = vmax.f32 %v215_v27, 0.0  ;;  %v789_v31 = vpop.f32.mrb[3].mxu0 }
 0x152   :  { %v221_v32 = vpack.c.bf16 %v220_v30, %v220_v30 }
 0x154   :  { %807 = vmatmul.mubr.bf16.vlgmr.msra.gmra.mrb[0].mxu1 %v221_v32 }
 0x155   :  { %846 = vmatprep.mubr.msk.bf16.mxu1 %vm1043_vm0, %v1042_v0  ;;  %831 = vmatpush3.bf16.msra.mxu1 %v903_v35 }
 0x156   :  { %832 = vmatprep.subr.bf16.mxu1 %v1042_v0 }
 0x159   :  { %833 = vmatpush3.bf16.msra.mxu1 %v904_v36 }
 0x15a   :  { %834 = vmatprep.subr.bf16.mxu1 %v1042_v0 }
 0x15d   :  { %835 = vmatpush3.bf16.msra.mxu1 %v905_v37 }
 0x15e   :  { %836 = vmatprep.subr.bf16.mxu1 %v1042_v0 }
 0x161   :  { %837 = vmatpush3.bf16.msra.mxu1 %v906_v38 }
 0x162   :  { %838 = vmatprep.subr.bf16.mxu1 %v1042_v0 }
 0x165   :  { %839 = vmatpush3.bf16.msra.mxu1 %v907_v39 }
 0x166   :  { %840 = vmatprep.subr.bf16.mxu1 %v1042_v0 }
 0x169   :  { %841 = vmatpush3.bf16.msra.mxu1 %v908_v40 }
 0x16a   :  { %842 = vmatprep.subr.bf16.mxu1 %v1042_v0 }
 0x16d   :  { %843 = vmatpush3.bf16.msra.mxu1 %v909_v49 }
 0x16e   :  { %844 = vmatprep.subr.bf16.mxu1 %v1042_v0 }
 0x171   :  { %845 = vmatpush3.bf16.msra.mxu1 %v910_v50 }
 0x227   :  { %v327_v42 = vpop.f32.mrb[0].mxu1 }
 0x228   :  { %v328_v43 = vadd.f32 %v689_v41, %v327_v42  ;;  %v808_v44 = vpop.f32.mrb[1].mxu1 }
 0x229   :  { %v330_v45 = vpop.f32.mrb[2].mxu1 }
 0x22a   :  { %v333_v46 = vmax.f32 %v328_v43, 0.0  ;;  %v809_v47 = vpop.f32.mrb[3].mxu1 }
 0x22c   :  { %v334_v48 = vpack.c.bf16 %v333_v46, %v333_v46 }
 0x22e   :  { %827 = vmatmul.mubr.bf16.vlgmr.msra.gmra.mrb[4].mxu0 %v334_v48 }
 0x22f   :  { %866 = vmatprep.mubr.msk.bf16.mxu0 %vm1043_vm0, %v1042_v0  ;;  %851 = vmatpush3.bf16.msra.mxu0 %v911_v51 }
 0x230   :  { %852 = vmatprep.subr.bf16.mxu0 %v1042_v0 }
 0x233   :  { %853 = vmatpush3.bf16.msra.mxu0 %v912_v52 }
 0x234   :  { %854 = vmatprep.subr.bf16.mxu0 %v1042_v0 }
 0x237   :  { %855 = vmatpush3.bf16.msra.mxu0 %v913_v53 }
 0x238   :  { %856 = vmatprep.subr.bf16.mxu0 %v1042_v0 }
 0x23b   :  { %857 = vmatpush3.bf16.msra.mxu0 %v914_v54 }
 0x23c   :  { %858 = vmatprep.subr.bf16.mxu0 %v1042_v0 }
 0x23f   :  { %859 = vmatpush3.bf16.msra.mxu0 %v915_v55 }
 0x240   :  { %860 = vmatprep.subr.bf16.mxu0 %v1042_v0 }
 0x243   :  { %861 = vmatpush3.bf16.msra.mxu0 %v916_v56 }
 0x244   :  { %862 = vmatprep.subr.bf16.mxu0 %v1042_v0 }
 0x247   :  { %863 = vmatpush3.bf16.msra.mxu0 %v917_v2 }
 0x248   :  { %864 = vmatprep.subr.bf16.mxu0 %v1042_v0 }
 0x24b   :  { %865 = vmatpush3.bf16.msra.mxu0 %v918_v3 }
 0x301   :  { %v440_v58 = vpop.f32.mrb[4].mxu0 }
 0x302   :  { %v441_v59 = vadd.f32 %v698_v57, %v440_v58  ;;  %v828_v60 = vpop.f32.mrb[5].mxu0 }
 0x303   :  { %v443_v61 = vpop.f32.mrb[6].mxu0 }
 0x304   :  { %v446_v62 = vmax.f32 %v441_v59, 0.0  ;;  %v829_v63 = vpop.f32.mrb[7].mxu0 }
 0x306   :  { %v447_v1 = vpack.c.bf16 %v446_v62, %v446_v62 }
 0x308   :  { %847 = vmatmul.mubr.bf16.vlgmr.msra.gmra.mrb[4].mxu1 %v447_v1 }
 0x3db   :  { %v553_v5 = vpop.f32.mrb[4].mxu1 }
 0x3dc   :  { %v554_v6 = vadd.f32 %v707_v4, %v553_v5  ;;  %v848_v7 = vpop.f32.mrb[5].mxu1 }
 0x3dd   :  { %v556_v8 = vpop.f32.mrb[6].mxu1 }
 0x3de   :  { %v559_v9 = vmax.f32 %v554_v6, 0.0  ;;  %v849_v10 = vpop.f32.mrb[7].mxu1 }
 0x3e0   :  { %v560_v11 = vpack.c.bf16 %v559_v9, %v559_v9 }
 0x3e2   :  { %867 = vmatmul.mubr.bf16.vlgmr.msra.gmra.mrb[8].mxu0 %v560_v11 }
 0x4b5   :  { %v666_v13 = vpop.f32.mrb[8].mxu0 }
 0x4b6   :  { %v667_v0 = vadd.f32 %v716_v12, %v666_v13  ;;  %v868_v14 = vpop.f32.mrb[9].mxu0 }
 0x4b7   :  { %v669_v15 = vpop.f32.mrb[10].mxu0 }
 0x4b8   :  { %672 = vst [vmem:[%s1275_s11] sm:$0xff] %v667_v0  ;;  %v869_v16 = vpop.f32.mrb[11].mxu0 }
 0x4b9   :  { %677 = vsyncpa [#allocation3], 1 }
 0x4ba   :  { %678 = vsyncpa [#allocation5], 1 }
 0x4bb   :  { %679 = vsyncpa [#allocation8], 1 }

</bundles_post_ra>
